<compile_context>
chip_gen: v7x
topology: tpu7x:2x2x1
jax: 0.10.0
libtpu: 0.0.40
codegen_flags: <defaults>
</compile_context>

<pallas_src>
import jax
import jax.numpy as jnp
from jax.experimental import pallas as pl
from jax.experimental.pallas import tpu as pltpu

_LANES = 128
_SMALL_N_FASTPATH = 2048  # below this, let XLA fuse the 5 flops in-place


def _feature_kernel(x_ref, o_ref):
    # x_ref: [2, TR, 128]  (row 0 = x1 slab, row 1 = x2 slab)
    # o_ref: [TR, 128]     (fully packed vregs, unmasked vst)
    x1 = x_ref[0]
    x2 = x_ref[1]
    o_ref[...] = (1.0 - x1 * x1) * (1.0 - x2 * x2)


def _round_up(n, m):
    return ((n + m - 1) // m) * m


def _tile_rows(rows_needed, dtype):
    """Generation-aware choice of tile rows (TR)."""
    kind = ""
    try:
        kind = jax.devices()[0].device_kind.lower()
    except Exception:
        pass

    # Sub-32-bit dtypes pack along sublanes -> need larger row multiples.
    itemsize = jnp.dtype(dtype).itemsize
    sublane = 8 * max(1, 4 // max(1, itemsize))

    # v7x has 2 TensorCores per chip: keep the grid >= 2 steps when there is
    # more than one minimal tile of work so both cores get a share.
    min_tiles = 2 if "v7" in kind else 1

    # VMEM-safe TR cap. Double-buffered footprint = 3 arrays x 2 bufs x TR*128*4B:
    #   TR=8192 -> 24 MiB (fits v6e / v7x 32 MiB scoped default)
    #   TR=4096 -> 12 MiB (fits v5e / older 16 MiB scoped default)
    tr_max = 8192 if ("v6" in kind or "v7" in kind) else 4096

    tr = _round_up(max(pl.cdiv(rows_needed, min_tiles), 1), sublane)
    return max(min(tr, tr_max), sublane)


def my_feature(x, force_pallas=False):
    """x: [N, 2] (cols x1, x2). Returns [N, 1] = (1 - x1^2)*(1 - x2^2)."""
    N, F = x.shape
    assert F == 2, "myFeature expects exactly the two columns x1, x2"
    dtype = x.dtype

    if N < _SMALL_N_FASTPATH and not force_pallas:
        # Deployment-size fast path: the standalone kernel boundary costs more
        # than the op itself; let XLA fuse it.
        # TODO(synk): fuse this feature into the downstream Fourier-embedding /
        # first-MLP Pallas kernel to remove the HBM round trip entirely.
        x1 = x[:, 0:1]
        x2 = x[:, 1:2]
        return (1.0 - x1 * x1) * (1.0 - x2 * x2)

    rows_needed = pl.cdiv(N, _LANES)
    tr = _tile_rows(rows_needed, dtype)
    n_tiles = pl.cdiv(rows_needed, tr)
    R = n_tiles * tr
    N_pad = R * _LANES

    # One pad pass (only if needed), one transpose pass, free reshape.
    if N_pad != N:
        x = jnp.pad(x, ((0, N_pad - N), (0, 0)))
    x_slab = jnp.transpose(x).reshape(2, R, _LANES)

    out_2d = pl.pallas_call(
        _feature_kernel,
        out_shape=jax.ShapeDtypeStruct((R, _LANES), dtype),
        grid=(n_tiles,),
        in_specs=[pl.BlockSpec((2, tr, _LANES), lambda i: (0, i, 0))],
        out_specs=pl.BlockSpec((tr, _LANES), lambda i: (i, 0)),
        compiler_params=pltpu.CompilerParams(
            dimension_semantics=("parallel",)),
    )(x_slab)

    out = out_2d.reshape(N_pad, 1)  # contiguous reshape: no copy
    if N_pad != N:
        out = out[:N, :]            # pay the slice pass only when padded
    return out


def _ref(x):
    x1 = x[:, 0:1]
    x2 = x[:, 1:2]
    return (1.0 - x1 ** 2) * (1.0 - x2 ** 2)


if __name__ == "__main__":
    # myFeature has no learnable parameters.
    key = jax.random.PRNGKey(0)

    # Small collocation batch in [-1, 1]^2 — force the Pallas path to
    # exercise the kernel.
    N = 256
    x = jax.random.uniform(key, (N, 2), dtype=jnp.float32,
                           minval=-1.0, maxval=1.0)
    out = jax.block_until_ready(my_feature(x, force_pallas=True))
    assert out.shape == (N, 1), out.shape
    assert jnp.allclose(out, _ref(x), atol=1e-6, rtol=1e-6), \
        "mismatch vs reference (Pallas path)"

    # Default (fast-path) call at the same deployment size.
    out_fp = jax.block_until_ready(my_feature(x))
    assert out_fp.shape == (N, 1)
    assert jnp.allclose(out_fp, _ref(x), atol=1e-6, rtol=1e-6), \
        "mismatch vs reference (fast path)"

    # Larger, non-aligned N to exercise padding + tiling.
    N2 = 5000
    x_big = jax.random.uniform(jax.random.PRNGKey(1), (N2, 2),
                               dtype=jnp.float32, minval=-1.0, maxval=1.0)
    out_big = jax.block_until_ready(my_feature(x_big, force_pallas=True))
    assert out_big.shape == (N2, 1), out_big.shape
    assert jnp.allclose(out_big, _ref(x_big), atol=1e-6, rtol=1e-6), \
        "mismatch vs reference (padded case)"

    print("KERNEL_OK")
</pallas_src>

<mosaic_0001>
module attributes {stable_mosaic.version = 11 : i64} {
  func.func @_feature_kernel(%arg0: i32, %arg1: memref<2x8x128xf32, #tpu.memory_space<vmem>>, %arg2: memref<8x128xf32, #tpu.memory_space<vmem>>) attributes {dimension_semantics = [#tpu.dimension_semantics<parallel>], iteration_bounds = array<i64: 1>, scalar_prefetch = 0 : i64, scratch_operands = 0 : i64, tpu.core_type = #tpu.core_type<tc>, window_params = [{transform_indices = @transform_0, window_bounds = array<i64: 2, 8, 128>}, {transform_indices = @transform_1, window_bounds = array<i64: 8, 128>}]} {
    %c0 = arith.constant 0 : index
    %c0_0 = arith.constant 0 : index
    %c0_1 = arith.constant 0 : index
    %0 = vector.load %arg1[%c0, %c0_0, %c0_1] : memref<2x8x128xf32, #tpu.memory_space<vmem>>, vector<1x8x128xf32>
    %1 = vector.shape_cast %0 : vector<1x8x128xf32> to vector<8x128xf32>
    %c1 = arith.constant 1 : index
    %c0_2 = arith.constant 0 : index
    %c0_3 = arith.constant 0 : index
    %2 = vector.load %arg1[%c1, %c0_2, %c0_3] : memref<2x8x128xf32, #tpu.memory_space<vmem>>, vector<1x8x128xf32>
    %3 = vector.shape_cast %2 : vector<1x8x128xf32> to vector<8x128xf32>
    %4 = arith.mulf %1, %1 : vector<8x128xf32>
    %cst = arith.constant 1.000000e+00 : f32
    %5 = vector.broadcast %cst : f32 to vector<8x128xf32>
    %6 = arith.subf %5, %4 : vector<8x128xf32>
    %7 = arith.mulf %3, %3 : vector<8x128xf32>
    %cst_4 = arith.constant 1.000000e+00 : f32
    %8 = vector.broadcast %cst_4 : f32 to vector<8x128xf32>
    %9 = arith.subf %8, %7 : vector<8x128xf32>
    %10 = arith.mulf %6, %9 : vector<8x128xf32>
    %c0_5 = arith.constant 0 : index
    %c0_6 = arith.constant 0 : index
    %11 = vector.load %arg2[%c0_5, %c0_6] : memref<8x128xf32, #tpu.memory_space<vmem>>, vector<8x128xf32>
    tpu.vector_store %arg2[%c0_5, %c0_6], %10 {strides = array<i32>} : memref<8x128xf32, #tpu.memory_space<vmem>>, vector<8x128xf32>,
    return
  }
  func.func @transform_0(%arg0: i32) -> (i32, i32, i32) {
    %c0_i32 = arith.constant 0 : i32
    %c0_i32_0 = arith.constant 0 : i32
    %c0_i32_1 = arith.constant 0 : i32
    return %c0_i32, %arg0, %c0_i32_0 : i32, i32, i32
  }
  func.func @transform_1(%arg0: i32) -> (i32, i32) {
    %c0_i32 = arith.constant 0 : i32
    %c0_i32_0 = arith.constant 0 : i32
    return %arg0, %c0_i32 : i32, i32
  }
}

</mosaic_0001>

<bundles_post_ra>
// kernel: tpu_custom_call.1
= control target key start
LH: loop header
LB: loop body
LE: loop exit
PB: predicated region body
PF: predicated region fallthrough
CT: control target
= control target key end

     0   :  { %6 = vsyncpa [#allocation3], 0  ;;  %s137_s0 = inlined_call_operand.hbm [shape: f32[2,8,128], index: 0, kind: input, shape index: {}]   ;;  %s138_s1 = inlined_call_operand.hbm [shape: f32[8,128], index: 1, kind: output, shape index: {}]  }
   0x1   :  { %7 = vsyncpa [#allocation4], 0  ;;  %s99_s6 = smov [#allocation2]   ;;  %s51_s10 = scalar_lea.hbm %s137_s0, 256 }
   0x2   :  { %s13_s7 = sshll.u32 %s99_s6, 4  ;;  %p52_p0 = scmp.ne.s32.totalorder %s137_s0, %s51_s10  ;;  %s14_s7 = int_to_ptr.vmem [resolvable:$true] %s13_s7 }
   0x3   :  { %p55_p1 = scmp.lt.u32.totalorder %s51_s10, %s137_s0 }
   0x5   :  { %p57_p2 = pnand %p55_p1, %p52_p0 }
   0x7   :  { %60 = shalt.err (!%p57_p2)
}
   0x8   :  { %s61_s15 = scalar_lea.vmem %s14_s7, 256  ;;  %p66_p4 = scmp.lt.s32.totalorder %s14_s7, %s14_s7 }
   0x9   :  { %p62_p3 = scmp.ne.s32.totalorder %s14_s7, %s61_s15  ;;  %p67_p5 = scmp.lt.s32.totalorder %s61_s15, %s61_s15 }
   0xb   :  { %p68_p6 = por %p67_p5, %p66_p4 }
   0xd   :  { %p69_p7 = pnand %p68_p6, %p62_p3 }
   0xf   :  { %72 = shalt.err (!%p69_p7)
}
  0x10   :  { %s100_s16 = smov 128   ;;  %s101_s17 = smov 8  }
  0x11   :  { %19 = dma.hbm_to_vmem [thread:$0]  %s137_s0, 256, %s14_s7, [#allocation3], %s100_s16, %s100_s16, %s101_s17  }
  0x12   :  { %95 = dma.done.wait [#allocation3], 256  }
  0x13   :  { %96 = vsyncadd [#allocation3], 4294967040  ;;  %v23_v0 = vld [vmem:[#allocation2] sm:$0xff]  ;;  %v25_v1 = vld [vmem:[#allocation2 + $0x8] sm:$0xff]  ;;  %s102_s20 = smov [#allocation5]  }
  0x14   :  { %v26_v2 = vmul.f32 %v23_v0, %v23_v0  ;;  %v28_v3 = vmul.f32 %v25_v1, %v25_v1  ;;  %s38_s21 = sshll.u32 %s102_s20, 4  ;;  %s39_s21 = int_to_ptr.vmem [resolvable:$true] %s38_s21 }
  0x15   :  { %s73_s22 = scalar_lea.vmem %s39_s21, 128  ;;  %p78_p9 = scmp.lt.s32.totalorder %s39_s21, %s39_s21 }
  0x16   :  { %v27_v4 = vsub.f32 1.0, %v26_v2  ;;  %v29_v5 = vsub.f32 1.0, %v28_v3  ;;  %p74_p8 = scmp.ne.s32.totalorder %s39_s21, %s73_s22  ;;  %p79_p10 = scmp.lt.s32.totalorder %s73_s22, %s73_s22 }
  0x18   :  { %v30_v6 = vmul.f32 %v29_v5, %v27_v4  ;;  %p80_p11 = por %p79_p10, %p78_p9 }
  0x1a   :  { %31 = vst [vmem:[#allocation5] sm:$0xff] %v30_v6  ;;  %p81_p12 = pnand %p80_p11, %p74_p8 }
  0x1c   :  { %84 = shalt.err (!%p81_p12)
}
  0x1d   :  { %s85_s24 = scalar_lea.hbm %s138_s1, 128 }
  0x1e   :  { %p86_p13 = scmp.ne.s32.totalorder %s138_s1, %s85_s24  ;;  %p89_p0 = scmp.lt.u32.totalorder %s85_s24, %s138_s1 }
  0x20   :  { %p91_p1 = pnand %p89_p0, %p86_p13 }
  0x22   :  { %94 = shalt.err (!%p91_p1)
}
  0x23   :  { %41 = dma.vmem_to_hbm [thread:$0]  %s39_s21, 128, %s138_s1, [#allocation4]  }
  0x24   :  { %97 = dma.done.wait [#allocation4], 128  }
  0x25   :  { %98 = vsyncadd [#allocation4], 4294967168 }
  0x26   :  { %45 = vsyncpa [#allocation3], 1 }
  0x27   :  { %46 = vsyncpa [#allocation4], 1 }

</bundles_post_ra>
